<compile_context>
chip_gen: v6e
topology: v6e:2x2x1
jax: 0.10.0
libtpu: 0.0.40
codegen_flags: <defaults>
</compile_context>

<pallas_src>
import jax
import jax.numpy as jnp
from jax.experimental import pallas as pl
from jax.experimental.pallas import tpu as pltpu


def _copy_kernel(x_ref, o_ref):
    # nearest-neighbor @ scale 1.0: src index == dst index -> pure tile copy.
    o_ref[...] = x_ref[...]


_MAX_BLOCK_BYTES = 4 << 20        # 4 MiB per pipelined buffer (~86% HBM roofline)
_SINGLE_BLOCK_BYTES = 4 << 20     # whole-array single block up to 4 MiB
_VMEM_LIMIT_BYTES = 32 << 20      # 2 in + 2 out 4 MiB buffers + slack; safe v5e/v6e/v7x
_LANE_CANDIDATES = (8192, 4096, 2048, 1024, 512, 256, 128)  # lane-dense last dims
_MIN_GRID_STEPS = 4               # grid path only worthwhile with >= 4 steps


def _sublane_multiple(dtype) -> int:
    """Native sublane tile for the dtype: 8 (4B), 16 (2B), 32 (1B)."""
    return {4: 8, 2: 16, 1: 32}.get(jnp.dtype(dtype).itemsize, 8)


def _identity_copy_2d(x2d: jax.Array) -> jax.Array:
    """Element-wise copy of a 2D slab via Pallas, tiled along rows (and lanes
    if a single row exceeds the block budget)."""
    rows, cols = x2d.shape
    dtype = x2d.dtype
    itemsize = jnp.dtype(dtype).itemsize
    total_bytes = rows * cols * itemsize
    cost = pl.CostEstimate(flops=0, transcendentals=0,
                           bytes_accessed=2 * total_bytes)
    sub = _sublane_multiple(dtype)

    # --- Small / mid inputs: one block, one DMA in, one DMA out. -------------
    # (Full-extent blocks are exempt from the (8, 128) divisibility rule.)
    if total_bytes <= _SINGLE_BLOCK_BYTES:
        return pl.pallas_call(
            _copy_kernel,
            out_shape=jax.ShapeDtypeStruct(x2d.shape, dtype),
            cost_estimate=cost,
        )(x2d)

    row_bytes = cols * itemsize

    if row_bytes <= _MAX_BLOCK_BYTES:
        # --- 1-D row tiling. --------------------------------------------------
        cap = max(sub, (_MAX_BLOCK_BYTES // row_bytes) // sub * sub)
        # Aim for at least _MIN_GRID_STEPS grid steps so the pipeline fills.
        target = max(sub, pl.cdiv(pl.cdiv(rows, _MIN_GRID_STEPS), sub) * sub)
        cap = min(cap, target)
        cap = min(cap, rows)  # full-extent rows are exempt from the sublane rule
        spec = pl.BlockSpec((cap, cols), lambda i: (i, 0))
        grid = (pl.cdiv(rows, cap),)
        dims = ("parallel",)
    else:
        # --- Lane axis too wide for one block: 2-D tiling. --------------------
        row_block = min(sub, rows)
        col_block = max(128, (_MAX_BLOCK_BYTES // (row_block * itemsize)) // 128 * 128)
        spec = pl.BlockSpec((row_block, col_block), lambda i, j: (i, j))
        grid = (pl.cdiv(rows, row_block), pl.cdiv(cols, col_block))
        dims = ("parallel", "parallel")

    return pl.pallas_call(
        _copy_kernel,
        out_shape=jax.ShapeDtypeStruct(x2d.shape, dtype),
        grid=grid,
        in_specs=[spec],
        out_specs=spec,
        cost_estimate=cost,
        compiler_params=pltpu.CompilerParams(
            dimension_semantics=dims,
            vmem_limit_bytes=_VMEM_LIMIT_BYTES,
        ),
    )(x2d)


def _best_lane_width(total: int):
    for lw in _LANE_CANDIDATES:
        if total % lw == 0:
            return lw
    return None


def interpolate_nearest_scale1(x_nchw: jax.Array) -> jax.Array:
    """F.interpolate(x, scale_factor=(1.0, 1.0), mode='nearest') on NCHW input."""
    n, c, h, w = x_nchw.shape
    total = n * c * h * w

    lane_w = _best_lane_width(total)
    if lane_w is not None:
        # Lane-dense 2D slab: last dim a multiple of 128 -> unmasked full vregs.
        x2d = x_nchw.reshape(total // lane_w, lane_w)
    else:
        # Element count not a multiple of 128 (e.g. the spec's 64 elements):
        # use the widest available lane dim (h*w beats w) to minimize masking.
        x2d = x_nchw.reshape(n * c, h * w)

    out2d = _identity_copy_2d(x2d)
    return out2d.reshape(n, c, h, w)


class Model:
    def __init__(self, key):
        # torch.nn.Linear(4, 4) params (unused in forward, kept for parity).
        k_w, k_b = jax.random.split(key)
        bound = 1.0 / jnp.sqrt(4.0)
        self.linear_w = jax.random.uniform(k_w, (4, 4), jnp.float32, -bound, bound)
        self.linear_b = jax.random.uniform(k_b, (4,), jnp.float32, -bound, bound)
        # jit so the dead permute is DCE'd and per-op dispatch disappears.
        self._forward = jax.jit(self._forward_impl)

    def _forward_impl(self, x1):
        v1 = interpolate_nearest_scale1(x1)
        v2 = jnp.transpose(v1, (0, 2, 3, 1))  # dead code (matches reference); DCE'd
        del v2
        return v1

    def forward(self, x1):
        return self._forward(x1)


if __name__ == "__main__":
    key = jax.random.PRNGKey(0)
    k_param, k_x = jax.random.split(key)

    model = Model(k_param)

    # 1) Spec-sized input (1, 4, 4, 4): 64 elements -> (4, 16) fallback slab,
    #    single-block path.
    x_small = jax.random.normal(k_x, (1, 4, 4, 4), dtype=jnp.float32)
    out_small = model.forward(x_small)
    jax.block_until_ready(out_small)
    assert out_small.shape == (1, 4, 4, 4)
    assert out_small.dtype == jnp.float32
    assert jnp.array_equal(out_small, x_small)  # nearest @ scale 1.0 is an exact copy

    # 2) Lane-dense single-block path (2048 elems -> (1, 2048) -> lw 2048 slab).
    x_mid = jax.random.normal(k_x, (2, 4, 16, 16), dtype=jnp.float32)
    out_mid = model.forward(x_mid)
    jax.block_until_ready(out_mid)
    assert jnp.array_equal(out_mid, x_mid)

    # 3) bf16 input (exercises dtype-aware sublane rounding; single-block path).
    x_bf16 = jax.random.normal(k_x, (2, 4, 16, 16), dtype=jnp.bfloat16)
    out_bf16 = model.forward(x_bf16)
    jax.block_until_ready(out_bf16)
    assert jnp.array_equal(out_bf16, x_bf16)

    # 4) Grid path: 2M f32 elems (8 MiB) -> (256, 8192) slab, 4 blocks of 2 MiB.
    x_big = jax.random.normal(k_x, (8, 8, 128, 256), dtype=jnp.float32)
    out_big = model.forward(x_big)
    jax.block_until_ready(out_big)
    assert jnp.array_equal(out_big, x_big)

    print("KERNEL_OK")
</pallas_src>

<mosaic_0001>
module attributes {stable_mosaic.version = 11 : i64} {
  func.func @_copy_kernel(%arg0: memref<4x16xf32, #tpu.memory_space<vmem>>, %arg1: memref<4x16xf32, #tpu.memory_space<vmem>>) attributes {dimension_semantics = [], scalar_prefetch = 0 : i64, scratch_operands = 0 : i64, tpu.core_type = #tpu.core_type<tc>} {
    %c0 = arith.constant 0 : index
    %c0_0 = arith.constant 0 : index
    %0 = vector.load %arg0[%c0, %c0_0] : memref<4x16xf32, #tpu.memory_space<vmem>>, vector<4x16xf32>
    %c0_1 = arith.constant 0 : index
    %c0_2 = arith.constant 0 : index
    %1 = vector.load %arg1[%c0_1, %c0_2] : memref<4x16xf32, #tpu.memory_space<vmem>>, vector<4x16xf32>
    tpu.vector_store %arg1[%c0_1, %c0_2], %0 {strides = array<i32>} : memref<4x16xf32, #tpu.memory_space<vmem>>, vector<4x16xf32>,
    return
  }
}

</mosaic_0001>

<bundles_post_ra>
// kernel: _forward_impl.1
= control target key start
LH: loop header
LB: loop body
LE: loop exit
PB: predicated region body
PF: predicated region fallthrough
CT: control target
= control target key end

     0   :  { %vm9_vm0 = vcmask 125952   ;;  %s31_s0 = inlined_call_operand.vmem [shape: f32[4,16], index: 0, kind: input, shape index: {}]   ;;  %s32_s1 = inlined_call_operand.vmem [shape: f32[4,16], index: 1, kind: output, shape index: {}]  }
   0x1   :  { %v8_v0 = vld [vmem:[%s31_s0] sm:$0xf] }
   0x2   :  { %10 = vst.msk [vmem:[%s32_s1] sm:$0xf] %vm9_vm0, %v8_v0 }

</bundles_post_ra>
